<compile_context>
chip_gen: v7x
topology: tpu7x:2x2x1
jax: 0.10.0
libtpu: 0.0.40
codegen_flags: <defaults>
</compile_context>

<pallas_src>
import functools

import jax
import jax.numpy as jnp
from jax.experimental import pallas as pl
from jax.experimental.pallas import tpu as pltpu


def _pick_tile(dim, candidates=(512, 256, 128)):
    """Largest MXU-friendly tile that divides `dim`; fall back to full dim."""
    for c in candidates:
        if dim % c == 0:
            return c
    return dim


def _barlow_kernel(z1_ref, z2_ref, part_ref, s_acc_ref, *, lambda_coeff, batch_size):
    i = pl.program_id(0)  # row tile of c
    j = pl.program_id(1)  # col tile of c
    k = pl.program_id(2)  # batch (reduction) tile

    lam = jnp.float32(lambda_coeff)
    inv_b = jnp.float32(1.0 / batch_size)

    # Zero this i-row's partial accumulator on its first (j, k) step.
    @pl.when(jnp.logical_and(j == 0, k == 0))
    def _():
        part_ref[...] = jnp.zeros_like(part_ref)

    # Zero the S-tile accumulator at the start of each batch reduction.
    @pl.when(k == 0)
    def _():
        s_acc_ref[...] = jnp.zeros_like(s_acc_ref)

    # S += z1_blk^T @ z2_blk, expressed as a batch-axis contraction so the MXU
    # consumes z1 directly (no XLU transpose); f32 accumulation.
    s_acc_ref[...] += jax.lax.dot_general(
        z1_ref[...],
        z2_ref[...],
        dimension_numbers=(((0,), (0,)), ((), ())),
        preferred_element_type=jnp.float32,
    )

    # Batch reduction done for this (i, j) tile -> fold into the per-i partial.
    @pl.when(k == pl.num_programs(2) - 1)
    def _():
        s = s_acc_ref[...]
        # lam * sum(c^2) contribution, with the 1/B^2 scaling deferred to scalars.
        part_ref[...] += lam * (inv_b * inv_b) * jnp.sum(s * s)

        # Diagonal correction: only on block-diagonal tiles.
        @pl.when(i == j)
        def _():
            td = s_acc_ref.shape[0]
            row = jax.lax.broadcasted_iota(jnp.int32, (td, td), 0)
            col = jax.lax.broadcasted_iota(jnp.int32, (td, td), 1)
            c_t = s * inv_b
            corr = jnp.sum(
                jnp.where(row == col, (c_t - 1.0) ** 2 - lam * c_t * c_t, 0.0)
            )
            part_ref[...] += corr


def barlow_twins_loss(z1, z2, *, lambda_coeff=0.005, block_d=None, block_b=None):
    """z1, z2: (B, D) arrays (f32 or bf16). Returns scalar f32 loss."""
    assert z1.shape == z2.shape and z1.ndim == 2
    B, D = z1.shape

    td = block_d if block_d is not None else _pick_tile(D)
    tb = block_b if block_b is not None else _pick_tile(B)
    assert D % td == 0 and B % tb == 0, (B, D, tb, td)
    gi = D // td
    gk = B // tb

    kernel = functools.partial(
        _barlow_kernel, lambda_coeff=float(lambda_coeff), batch_size=B
    )

    partials = pl.pallas_call(
        kernel,
        out_shape=jax.ShapeDtypeStruct((gi, 1, 1), jnp.float32),
        grid_spec=pltpu.PrefetchScalarGridSpec(
            num_scalar_prefetch=0,
            grid=(gi, gi, gk),
            in_specs=[
                pl.BlockSpec((tb, td), lambda i, j, k: (k, i)),
                pl.BlockSpec((tb, td), lambda i, j, k: (k, j)),
            ],
            out_specs=pl.BlockSpec((1, 1, 1), lambda i, j, k: (i, 0, 0)),
            scratch_shapes=[pltpu.VMEM((td, td), jnp.float32)],
        ),
        compiler_params=pltpu.CompilerParams(
            dimension_semantics=("parallel", "arbitrary", "arbitrary"),
        ),
        cost_estimate=pl.CostEstimate(
            flops=2 * B * D * D,
            transcendentals=0,
            bytes_accessed=2 * B * D * z1.dtype.itemsize + gi * 4,
        ),
    )(z1, z2)

    # Gi tiny partials -> scalar.
    return jnp.sum(partials)


def _reference_loss(z1, z2, lambda_coeff=0.005):
    # Pure-JAX mirror of the PyTorch forward (off-diagonal flatten trick).
    b = z1.shape[0]
    c = (z1.T @ z2) / b
    on_diag = jnp.sum((jnp.diagonal(c) - 1.0) ** 2)
    n = c.shape[0]
    off = jnp.reshape(jnp.ravel(c)[:-1], (n - 1, n + 1))[:, 1:]
    off_diag = jnp.sum(off**2)
    return on_diag + lambda_coeff * off_diag


if __name__ == "__main__":
    key = jax.random.PRNGKey(0)
    k1, k2 = jax.random.split(key)

    # Small shapes, but chosen so the tiled path is exercised:
    # grid = (3, 3, 2) with block_d=128, block_b=64.
    B, D = 128, 384
    z1 = jax.random.normal(k1, (B, D), dtype=jnp.float32)
    z2 = jax.random.normal(k2, (B, D), dtype=jnp.float32)

    loss = barlow_twins_loss(z1, z2, lambda_coeff=0.005, block_d=128, block_b=64)
    loss = jax.block_until_ready(loss)

    ref = _reference_loss(z1, z2, 0.005)
    assert jnp.allclose(loss, ref, rtol=2e-5, atol=1e-3), (loss, ref)

    print("KERNEL_OK")
</pallas_src>

<mosaic_0001>
module attributes {stable_mosaic.version = 11 : i64} {
  func.func @_barlow_kernel(%arg0: i32, %arg1: i32, %arg2: i32, %arg3: memref<64x128xf32, #tpu.memory_space<vmem>>, %arg4: memref<64x128xf32, #tpu.memory_space<vmem>>, %arg5: memref<1x1x1xf32, #tpu.memory_space<vmem>>, %arg6: memref<128x128xf32, #tpu.memory_space<vmem>>) attributes {dimension_semantics = [#tpu.dimension_semantics<parallel>, #tpu.dimension_semantics<arbitrary>, #tpu.dimension_semantics<arbitrary>], iteration_bounds = array<i64: 3, 3, 2>, scalar_prefetch = 0 : i64, scratch_operands = 1 : i64, tpu.core_type = #tpu.core_type<tc>, window_params = [{transform_indices = @transform_0, window_bounds = array<i64: 64, 128>}, {transform_indices = @transform_1, window_bounds = array<i64: 64, 128>}, {transform_indices = @transform_2, window_bounds = array<i64: 1, 1, 1>}]} {
    %c0_i32 = arith.constant 0 : i32
    %0 = arith.cmpi eq, %arg1, %c0_i32 : i32
    %c0_i32_0 = arith.constant 0 : i32
    %1 = arith.cmpi eq, %arg2, %c0_i32_0 : i32
    %2 = arith.andi %0, %1 : i1
    %3 = arith.extui %2 : i1 to i32
    %c0_i32_1 = arith.constant 0 : i32
    %4 = arith.cmpi ne, %3, %c0_i32_1 : i32
    scf.if %4 {
      %cst_14 = arith.constant 0.000000e+00 : f32
      %17 = vector.broadcast %cst_14 : f32 to vector<1x1x1xf32>
      %c0_15 = arith.constant 0 : index
      %c0_16 = arith.constant 0 : index
      %c0_17 = arith.constant 0 : index
      %18 = vector.load %arg5[%c0_15, %c0_16, %c0_17] : memref<1x1x1xf32, #tpu.memory_space<vmem>>, vector<1x1x1xf32>
      tpu.vector_store %arg5[%c0_15, %c0_16, %c0_17], %17 {strides = array<i32>} : memref<1x1x1xf32, #tpu.memory_space<vmem>>, vector<1x1x1xf32>,
    } else {
    }
    %c0_i32_2 = arith.constant 0 : i32
    %5 = arith.cmpi eq, %arg2, %c0_i32_2 : i32
    %6 = arith.extui %5 : i1 to i32
    %c0_i32_3 = arith.constant 0 : i32
    %7 = arith.cmpi ne, %6, %c0_i32_3 : i32
    scf.if %7 {
      %cst_14 = arith.constant 0.000000e+00 : f32
      %17 = vector.broadcast %cst_14 : f32 to vector<128x128xf32>
      %c0_15 = arith.constant 0 : index
      %c0_16 = arith.constant 0 : index
      %18 = vector.load %arg6[%c0_15, %c0_16] : memref<128x128xf32, #tpu.memory_space<vmem>>, vector<128x128xf32>
      tpu.vector_store %arg6[%c0_15, %c0_16], %17 {strides = array<i32>} : memref<128x128xf32, #tpu.memory_space<vmem>>, vector<128x128xf32>,
    } else {
    }
    %c0 = arith.constant 0 : index
    %c0_4 = arith.constant 0 : index
    %8 = vector.load %arg6[%c0, %c0_4] : memref<128x128xf32, #tpu.memory_space<vmem>>, vector<128x128xf32>
    %c0_5 = arith.constant 0 : index
    %c0_6 = arith.constant 0 : index
    %9 = vector.load %arg3[%c0_5, %c0_6] : memref<64x128xf32, #tpu.memory_space<vmem>>, vector<64x128xf32>
    %c0_7 = arith.constant 0 : index
    %c0_8 = arith.constant 0 : index
    %10 = vector.load %arg4[%c0_7, %c0_8] : memref<64x128xf32, #tpu.memory_space<vmem>>, vector<64x128xf32>
    %cst = arith.constant dense<0.000000e+00> : vector<128x128xf32>
    %11 = tpu.matmul %9, %10, %cst {dimension_numbers = #tpu.dot_dimension_numbers<[0], [0], [1], [1], [0, 1, 1, 1], [], []>} : vector<64x128xf32>, vector<64x128xf32>, vector<128x128xf32> -> vector<128x128xf32>
    %12 = arith.addf %8, %11 : vector<128x128xf32>
    %c0_9 = arith.constant 0 : index
    %c0_10 = arith.constant 0 : index
    %13 = vector.load %arg6[%c0_9, %c0_10] : memref<128x128xf32, #tpu.memory_space<vmem>>, vector<128x128xf32>
    tpu.vector_store %arg6[%c0_9, %c0_10], %12 {strides = array<i32>} : memref<128x128xf32, #tpu.memory_space<vmem>>, vector<128x128xf32>,
    %c1_i32 = arith.constant 1 : i32
    %14 = arith.cmpi eq, %arg2, %c1_i32 : i32
    %15 = arith.extui %14 : i1 to i32
    %cst_11 = arith.constant 7.812500e-03 : f32
    %cst_12 = arith.constant 5.000000e-03 : f32
    %c0_i32_13 = arith.constant 0 : i32
    %16 = arith.cmpi ne, %15, %c0_i32_13 : i32
    scf.if %16 {
      %c0_14 = arith.constant 0 : index
      %c0_15 = arith.constant 0 : index
      %17 = vector.load %arg6[%c0_14, %c0_15] : memref<128x128xf32, #tpu.memory_space<vmem>>, vector<128x128xf32>
      %c0_16 = arith.constant 0 : index
      %c0_17 = arith.constant 0 : index
      %c0_18 = arith.constant 0 : index
      %18 = vector.load %arg5[%c0_16, %c0_17, %c0_18] : memref<1x1x1xf32, #tpu.memory_space<vmem>>, vector<1x1x1xf32>
      %19 = arith.mulf %cst_11, %cst_11 : f32
      %20 = arith.mulf %cst_12, %19 : f32
      %21 = arith.mulf %17, %17 : vector<128x128xf32>
      %22 = vector.shape_cast %21 : vector<128x128xf32> to vector<1x128x128xf32>
      %cst_19 = arith.constant dense<0.000000e+00> : vector<1xf32>
      %23 = vector.multi_reduction <add>, %22, %cst_19 [1, 2] : vector<1x128x128xf32> to vector<1xf32>
      %24 = vector.shape_cast %23 : vector<1xf32> to vector<1x1x1xf32>
      %25 = vector.extract %24[0, 0, 0] : f32 from vector<1x1x1xf32>
      %26 = arith.mulf %20, %25 : f32
      %27 = vector.broadcast %26 : f32 to vector<1x1x1xf32>
      %28 = arith.addf %18, %27 : vector<1x1x1xf32>
      %c0_20 = arith.constant 0 : index
      %c0_21 = arith.constant 0 : index
      %c0_22 = arith.constant 0 : index
      %29 = vector.load %arg5[%c0_20, %c0_21, %c0_22] : memref<1x1x1xf32, #tpu.memory_space<vmem>>, vector<1x1x1xf32>
      tpu.vector_store %arg5[%c0_20, %c0_21, %c0_22], %28 {strides = array<i32>} : memref<1x1x1xf32, #tpu.memory_space<vmem>>, vector<1x1x1xf32>,
      %30 = arith.cmpi eq, %arg0, %arg1 : i32
      %31 = arith.extui %30 : i1 to i32
      %c0_i32_23 = arith.constant 0 : i32
      %32 = arith.cmpi ne, %31, %c0_i32_23 : i32
      scf.if %32 {
        %33 = tpu.iota {dimensions = array<i32: 0>} : vector<128x128xi32>
        %34 = tpu.iota {dimensions = array<i32: 1>} : vector<128x128xi32>
        %35 = vector.broadcast %cst_11 : f32 to vector<128x128xf32>
        %36 = arith.mulf %17, %35 : vector<128x128xf32>
        %37 = arith.cmpi eq, %33, %34 : vector<128x128xi32>
        %cst_24 = arith.constant 1.000000e+00 : f32
        %38 = vector.broadcast %cst_24 : f32 to vector<128x128xf32>
        %39 = arith.subf %36, %38 : vector<128x128xf32>
        %40 = arith.mulf %39, %39 : vector<128x128xf32>
        %41 = vector.broadcast %cst_12 : f32 to vector<128x128xf32>
        %42 = arith.mulf %41, %36 : vector<128x128xf32>
        %43 = arith.mulf %42, %36 : vector<128x128xf32>
        %44 = arith.subf %40, %43 : vector<128x128xf32>
        %cst_25 = arith.constant 0.000000e+00 : f32
        %45 = vector.broadcast %cst_25 : f32 to vector<128x128xf32>
        %46 = arith.select %37, %44, %45 : vector<128x128xi1>, vector<128x128xf32>
        %47 = vector.shape_cast %46 : vector<128x128xf32> to vector<1x128x128xf32>
        %cst_26 = arith.constant dense<0.000000e+00> : vector<1xf32>
        %48 = vector.multi_reduction <add>, %47, %cst_26 [1, 2] : vector<1x128x128xf32> to vector<1xf32>
        %49 = vector.shape_cast %48 : vector<1xf32> to vector<1x1x1xf32>
        %50 = vector.extract %49[0, 0, 0] : f32 from vector<1x1x1xf32>
        %c0_27 = arith.constant 0 : index
        %c0_28 = arith.constant 0 : index
        %c0_29 = arith.constant 0 : index
        %51 = vector.load %arg5[%c0_27, %c0_28, %c0_29] : memref<1x1x1xf32, #tpu.memory_space<vmem>>, vector<1x1x1xf32>
        %52 = vector.broadcast %50 : f32 to vector<1x1x1xf32>
        %53 = arith.addf %51, %52 : vector<1x1x1xf32>
        %c0_30 = arith.constant 0 : index
        %c0_31 = arith.constant 0 : index
        %c0_32 = arith.constant 0 : index
        %54 = vector.load %arg5[%c0_30, %c0_31, %c0_32] : memref<1x1x1xf32, #tpu.memory_space<vmem>>, vector<1x1x1xf32>
        tpu.vector_store %arg5[%c0_30, %c0_31, %c0_32], %53 {strides = array<i32>} : memref<1x1x1xf32, #tpu.memory_space<vmem>>, vector<1x1x1xf32>,
      } else {
      }
    } else {
    }
    return
  }
  func.func @transform_0(%arg0: i32, %arg1: i32, %arg2: i32) -> (i32, i32) {
    %c0_i32 = arith.constant 0 : i32
    return %arg2, %arg0 : i32, i32
  }
  func.func @transform_1(%arg0: i32, %arg1: i32, %arg2: i32) -> (i32, i32) {
    %c0_i32 = arith.constant 0 : i32
    return %arg2, %arg1 : i32, i32
  }
  func.func @transform_2(%arg0: i32, %arg1: i32, %arg2: i32) -> (i32, i32, i32) {
    %c0_i32 = arith.constant 0 : i32
    %c0_i32_0 = arith.constant 0 : i32
    %c0_i32_1 = arith.constant 0 : i32
    return %arg0, %c0_i32, %c0_i32_0 : i32, i32, i32
  }
}

</mosaic_0001>

<bundles_post_ra>
// kernel: tpu_custom_call.1
= control target key start
LH: loop header
LB: loop body
LE: loop exit
PB: predicated region body
PF: predicated region fallthrough
CT: control target
= control target key end

     0   :  { %s1867_s0 = inlined_call_operand.hbm [shape: f32[128,384], index: 0, kind: input, shape index: {}]   ;;  %s1868_s1 = inlined_call_operand.hbm [shape: f32[128,384], index: 1, kind: input, shape index: {}]   ;;  %s1869_s2 = inlined_call_operand.vmem [shape: f32[3,1,1], index: 2, kind: output, shape index: {}]  }
   0x1   :  { %1881 = sst [smem:[#allocation13_spill]] %s1867_s0 }
   0x2   :  { %1882 = sst [smem:[#allocation14_spill]] %s1869_s2 }
   0x3   :  { %7 = vsyncpa [#allocation4], 0 }
   0x4   :  { %9 = vsyncpa [#allocation4 + $0x1], 0 }
   0x5   :  { %10 = vsyncpa [#allocation6], 0 }
   0x6   :  { %12 = vsyncpa [#allocation6 + $0x1], 0  ;;  %s1356_s9 = smov 0   ;;  %s1358_s10 = smov 0  }
   0x7   :  { %s1360_s11 = smov 0   ;;  %s1362_s12 = smov 0  }
   0x8   :  { %s1364_s13 = smov 0   ;;  %s1366_s14 = smov 0  }
   0x9   :  { %s1368_s15 = smov 0   ;;  %s1370_s16 = smov 0  }
   0xa   :  { %s1372_s17 = smov 0   ;;  %s1374_s18 = smov 0  }
   0xb   :  { %s1376_s19 = smov 0   ;;  %s1378_s20 = smov 0  }
   0xc   :  { %s1380_s21 = smov 0  }
   0xd LB: > { %1883 = sst [smem:[#allocation9_spill]] %s1308_s15  ;;  %s894_s22 = sadd.s32 4294967295, %s1332_s21   ;;  %s1332_s21 = sphi %s1380_s21, %s18_s21   ;;  %s1328_s20 = sphi %s1378_s20, %s1928_s20   ;;  %s1324_s19 = sphi %s1376_s19, %s1927_s19   ;;  %s1320_s18 = sphi %s1374_s18, %s1926_s18   ;;  %s1316_s17 = sphi %s1372_s17, %s1925_s17   ;;  %s1312_s16 = sphi %s1370_s16, %s1924_s16   ;;  %s1308_s15 = sphi %s1368_s15, %s1923_s15   ;;  %s1304_s14 = sphi %s1366_s14, %s1922_s14   ;;  %s1300_s13 = sphi %s1364_s13, %s1921_s13   ;;  %s1296_s12 = sphi %s1362_s12, %s1920_s12   ;;  %s1292_s11 = sphi %s1360_s11, %s1919_s11   ;;  %s1288_s10 = sphi %s1358_s10, %s1918_s10   ;;  %s1284_s9 = sphi %s1356_s9, %s1917_s9  }
   0xe   : > { %1884 = sst [smem:[#allocation10_spill]] %s1312_s16  ;;  %s30_s23 = sadd.s32 1, %s1320_s18 }
   0xf   : > { %p1421_p0 = scmp.ge.s32.totalorder %s30_s23, 2  ;;  %p53_p1 = scmp.ne.s32.totalorder %s1304_s14, %s1300_s13 }
  0x10   : > { %p1872_p2 = scmp.eq.s32.totalorder %s1332_s21, 0  ;;  %p59_p3 = scmp.ne.s32.totalorder %s1300_s13, %s1296_s12 }
  0x11   : > { %s1930_s23 = smov (%p1421_p0, %s30_s23), 0  ;;  %p1439_p4 = scmp.eq.s32.totalorder %s894_s22, 0 }
  0x12   : > { %1886 = sst [smem:[#allocation11_spill]] %s1930_s23  ;;  %s1437_s27 = ssub.s32 %s1320_s18, %s1930_s23 }
  0x13   : > { %s1887_s28 = scalar_select %p1439_p4, 1, 0 }
  0x14   : > { %p55_p5 = por %p1872_p2, %p53_p1  ;;  %p1447_p6 = por %p1439_p4, %p59_p3 }
  0x15   : > { %p1871_p7 = scmp.lt.s32.totalorder %s1332_s21, 18  ;;  %s137_s30 = sand.u32 1, %s1304_s14  }
  0x16   : > { %s1888_s29 = scalar_select %p1447_p6, 1, 0 }
  0x17   : > { %s1870_s3 = smul.u32 24, %s1320_s18  ;;  %s898_s4 = sshll.u32 %s137_s30, 6 }
  0x18   : > { %s141_s7 = scalar_lea.vmem [#allocation3], %s898_s4  ;;  %s1889_s0 = sld [smem:[#allocation13_spill]] }
  0x19   : > { %s147_s5 = sadd.s32 %s1328_s20, %s1870_s3  ;;  %s150_s8 = sshll.u32 %s141_s7, 4  ;;  %s1462_s8 = int_to_ptr.vmem [resolvable:$true] %s150_s8 }
  0x1a   : > { %s901_s6 = sshll.u32 %s147_s5, 7  ;;  %p1466_p8 = pnand %p1871_p7, %p55_p5 }
  0x1b   : > { %s1471_s4 = scalar_lea.sflag [#allocation4], %s137_s30 }
  0x1c   : > { %p1164_p11 = pneg %p1466_p8 }
  0x1e   : > { %s1460_s26 = scalar_lea.hbm %s1889_s0, %s901_s6  ;;  %s1167_s12 = scalar_lea.hbm %s1889_s0, 6144 }
  0x1f   : > { %s1162_s5 = scalar_lea.hbm %s1460_s26, 1024  ;;  %p1168_p1 = scmp.lt.u32.totalorder %s1460_s26, %s1889_s0 }
  0x20   : > { %p1163_p10 = scmp.ne.s32.totalorder %s1460_s26, %s1162_s5  ;;  %p1169_p3 = scmp.lt.u32.totalorder %s1167_s12, %s1162_s5 }
  0x21   : > { %p1171_p7 = scmp.lt.u32.totalorder %s1162_s5, %s1460_s26 }
  0x22   : > { %p1165_p12 = pnand %p1164_p11, %p1163_p10  ;;  %p1170_p5 = por %p1169_p3, %p1168_p1 }
  0x24   : > { %p1166_p13 = pneg %p1165_p12  ;;  %p1172_p2 = por %p1171_p7, %p1170_p5 }
  0x26   : > { %p1173_p9 = pnand %p1172_p2, %p1166_p13 }
  0x28   : > { %1176 = shalt.err (!%p1173_p9)
}
  0x29   : > { %s1177_s30 = scalar_lea.vmem %s1462_s8, 1024  ;;  %s1334_s6 = smov [#allocation3]  }
  0x2a   : > { %p1178_p10 = scmp.ne.s32.totalorder %s1462_s8, %s1177_s30  ;;  %s1182_s7 = sshll.u32 %s1334_s6, 4  ;;  %s1183_s7 = int_to_ptr.vmem [resolvable:$false] %s1182_s7 }
  0x2b   : > { %s1184_s3 = scalar_lea.vmem %s1183_s7, 2048  ;;  %p1185_p4 = scmp.lt.s32.totalorder %s1462_s8, %s1183_s7 }
  0x2c   : > { %p1180_p12 = pnand %p1178_p10, %p1164_p11  ;;  %p1186_p1 = scmp.lt.s32.totalorder %s1184_s3, %s1177_s30 }
  0x2e   : > { %p1181_p6 = pneg %p1180_p12  ;;  %p1187_p3 = por %p1186_p1, %p1185_p4 }
  0x30   : > { %p1188_p7 = pnand %p1187_p3, %p1181_p6 }
  0x32   : > { %1191 = shalt.err (!%p1188_p7)
}
  0x33   : > { %s1875_s5 = smov 384   ;;  %s1876_s12 = smov 128  }
  0x34   : > { %s1877_s22 = smov 8   ;;  %p181_p2 = scmp.lt.s32.totalorder %s1332_s21, 19 }
  0x35   : > { %1047 = dma.hbm_to_vmem [thread:$0]  (!%p1466_p8), %s1460_s26, 1024, %s1462_s8, %s1471_s4, %s1875_s5, %s1876_s12, %s1877_s22  }
  0x36   : > { %p1891_p4 = scmp.ge.s32.totalorder %s1332_s21, 1  ;;  %s33_s6 = sadd.s32 1, %s1324_s19 }
  0x37   : > { %s74_s7 = sadd.s32 1, %s1292_s11  ;;  %s1932_s6 = smov (!%p1421_p0, %s33_s6), %s1324_s19 }
  0x38   : > { %p1505_p6 = pnand %p1891_p4, %p181_p2  ;;  %p81_p9 = scmp.ne.s32.totalorder %s1292_s11, %s1288_s10 }
  0x39   : > { %p87_p11 = scmp.ne.s32.totalorder %s1288_s10, %s1284_s9  ;;  %p35_p13 = scmp.ge.s32.totalorder %s1932_s6, 3 }
  0x3a   : > { %s160_s25 = sand.u32 1, %s1292_s11   ;;  %p1893_p8 = scmp.eq.s32.totalorder %s1332_s21, 0 }
  0x3b   : > { %p1895_p10 = scmp.ne.s32.totalorder %s1887_s28, 0  ;;  %s1934_s6 = smov (%p35_p13, %s1932_s6), 0 }
  0x3c   : > { %p1521_p5 = por %p81_p9, %p1893_p8  ;;  %1897 = sst [smem:[#allocation12_spill]] %s1934_s6 }
  0x3d   : > { %p1527_p12 = por %p87_p11, %p1895_p10  ;;  %s1898_s24 = sadd.s32 1, %s1328_s20 }
  0x3e   : > { %s1936_s24 = smov (!%p35_p13, %s1898_s24), %s1328_s20  ;;  %s70_s9 = ssub.s32 %s1324_s19, %s1934_s6 }
  0x3f   : > { %s1896_s8 = scalar_select %p1527_p12, 1, 0 }
  0x40   : > { %p39_p0 = scmp.ge.s32.totalorder %s1936_s24, 3  ;;  %s71_s4 = sor.u32 %s70_s9, %s1437_s27 }
  0x41   : > { %p72_p1 = scmp.eq.s32.totalorder %s71_s4, 0  ;;  %s902_s3 = sshll.u32 %s160_s25, 6 }
  0x42   : > { %s1938_s24 = smov (%p39_p0, %s1936_s24), 0  ;;  %s1899_s22 = smul.u32 24, %s1320_s18 }
  0x43   : > { %s1542_s28 = scalar_select %p72_p1, %s1292_s11, %s74_s7  }
  0x44   : > { %s42_s5 = ssub.s32 %s1328_s20, %s1938_s24  ;;  %s170_s0 = sadd.s32 %s1324_s19, %s1899_s22 }
  0x45   : > { %s43_s12 = sor.u32 %s42_s5, %s1437_s27  ;;  %s905_s23 = sshll.u32 %s170_s0, 7 }
  0x46   : > { %p44_p3 = scmp.eq.s32.totalorder %s43_s12, 0  ;;  %s1553_s6 = scalar_lea.hbm %s1868_s1, %s905_s23 }
  0x47   : > { %s164_s9 = scalar_lea.vmem [#allocation5], %s902_s3  ;;  %s1900_s16 = sadd.s32 1, %s1304_s14 }
  0x48   : > { %s173_s4 = sshll.u32 %s164_s9, 4  ;;  %p1901_p7 = scmp.lt.s32.totalorder %s1332_s21, 18  ;;  %s1560_s4 = int_to_ptr.vmem [resolvable:$true] %s173_s4 }
  0x49   : > { %s1558_s7 = scalar_select %p44_p3, %s1304_s14, %s1900_s16  }
  0x4a   : > { %p1566_p2 = pnand %p1901_p7, %p1521_p5  ;;  %s1570_s2 = scalar_lea.sflag [#allocation6], %s160_s25 }
  0x4b   : > { %s1192_s15 = scalar_lea.hbm %s1553_s6, 1024  ;;  %s1197_s27 = scalar_lea.hbm %s1868_s1, 6144 }
  0x4c   : > { %p1193_p4 = scmp.ne.s32.totalorder %s1553_s6, %s1192_s15  ;;  %p1194_p9 = pneg %p1566_p2 }
  0x4d   : > { %p1198_p8 = scmp.lt.u32.totalorder %s1553_s6, %s1868_s1  ;;  %p1199_p5 = scmp.lt.u32.totalorder %s1197_s27, %s1192_s15 }
  0x4e   : > { %p1195_p11 = pnand %p1194_p9, %p1193_p4  ;;  %p1201_p0 = scmp.lt.u32.totalorder %s1192_s15, %s1553_s6 }
  0x4f   : > { %p1200_p10 = por %p1199_p5, %p1198_p8 }
  0x50   : > { %p1196_p13 = pneg %p1195_p11 }
  0x51   : > { %p1202_p1 = por %p1201_p0, %p1200_p10 }
  0x53   : > { %p1203_p3 = pnand %p1202_p1, %p1196_p13 }
  0x55   : > { %1206 = shalt.err (!%p1203_p3)
}
  0x56   : > { %s1207_s22 = scalar_lea.vmem %s1560_s4, 1024  ;;  %s1338_s25 = smov [#allocation5]  }
  0x57   : > { %p1208_p7 = scmp.ne.s32.totalorder %s1560_s4, %s1207_s22  ;;  %s1212_s26 = sshll.u32 %s1338_s25, 4  ;;  %s1213_s26 = int_to_ptr.vmem [resolvable:$false] %s1212_s26 }
  0x58   : > { %s1214_s3 = scalar_lea.vmem %s1213_s26, 2048  ;;  %p1215_p12 = scmp.lt.s32.totalorder %s1560_s4, %s1213_s26 }
  0x59   : > { %p1210_p4 = pnand %p1208_p7, %p1194_p9  ;;  %p1216_p8 = scmp.lt.s32.totalorder %s1214_s3, %s1207_s22 }
  0x5b   : > { %p1211_p11 = pneg %p1210_p4  ;;  %p1217_p5 = por %p1216_p8, %p1215_p12 }
  0x5d   : > { %p1218_p10 = pnand %p1217_p5, %p1211_p11 }
  0x5f   : > { %1221 = shalt.err (!%p1218_p10)
}
  0x60   : > { %s1903_s9 = smov 8   ;;  %s1904_s15 = smov 128  }
  0x61   : > { %s1905_s16 = smov 384   ;;  %185 = sbr.rel (%p1505_p6) target bundleno = 1009 (0x3f1), region = 28 }
  0x62   : > { %1050 = dma.hbm_to_vmem [thread:$0]  (!%p1566_p2), %s1553_s6, 1024, %s1560_s4, %s1570_s2, %s1905_s16, %s1904_s15, %s1903_s9  }
  0x63   : > { %s187_s23 = sand.u32 (!%p1505_p6), 1, %s1300_s13   ;;  %p1906_p12 = scmp.ne.s32.totalorder (!%p1505_p6), %s1888_s29, 0 }
  0x64   : > { %s907_s27 = sshll.u32 (!%p1505_p6), %s187_s23, 6  ;;  %s188_s5 = scalar_lea.sflag (!%p1505_p6), [#allocation4], %s187_s23 }
  0x65   : > { %s1604_s12 = scalar_lea.vmem (!%p1505_p6), [#allocation3], %s907_s27 }
  0x68   : > { %1275 = dma.done.wait (%p1906_p12), %s188_s5, 1024  }
  0x69   : > { %1277 = vsyncadd (%p1906_p12), %s188_s5, 4294966272  ;;  %s196_s0 = sand.u32 1, %s1288_s10   ;;  %p1907_p6 = scmp.ne.s32.totalorder %s1896_s8, 0 }
  0x6a   : > { %s908_s22 = sshll.u32 %s196_s0, 6  ;;  %s197_s6 = scalar_lea.sflag [#allocation6], %s196_s0 }
  0x6b   : > { %s1611_s4 = scalar_lea.vmem [#allocation5], %s908_s22 }
  0x6c   : > { %1279 = dma.done.wait (%p1907_p6), %s197_s6, 1024  }
  0x6d   : > { %1281 = vsyncadd (%p1907_p6), %s197_s6, 4294966272  ;;  %s1908_s30 = sld [smem:[#allocation10_spill]]  ;;  %s1909_s2 = sld [smem:[#allocation9_spill]] }
  0x6e   : > { %p226_p2 = scmp.lt.s32.totalorder %s1316_s17, 2  ;;  %s1910_s3 = sld [smem:[#allocation14_spill]] }
  0x70   : > { %s227_s29 = scalar_select %p226_p2, %s1316_s17, 2 }
  0x73   : > { %p229_p9 = scmp.eq.s32.totalorder %s1908_s30, 0  ;;  %p230_p13 = scmp.eq.s32.totalorder %s1909_s2, 0 }
  0x74   : > { %s1624_s9 = scalar_lea.vmem %s1910_s3, %s227_s29 }
  0x75   : > { %p231_p0 = pnand %p230_p13, %p229_p9 }
  0x76   : > { %vm235_vm0 = vcmask (!%p231_p0), 0   ;;  %v1339_v0 = vmov (!%p231_p0), 0.0  }
  0x77   : > { %234 = sbr.rel (%p231_p0) target bundleno = 126 (0x7e), region = 40  ;;  %236 = vst.msk [vmem:[%s1624_s9] sm:$0x1] (!%p231_p0), %vm235_vm0, %v1339_v0 }
  0x7e PF: > { %s1911_s8 = sld [smem:[#allocation9_spill]] }
  0x84   : > { %p909_p1 = scmp.ne.s32.totalorder %s1911_s8, 0 }
  0x85   : > { %v1340_v1 = vmov (!%p909_p1), 0.0  }
  0x86   : > { %239 = sbr.rel (%p909_p1) target bundleno = 142 (0x8e), region = 44  ;;  %240 = vst [vmem:[#allocation2] sm:$0xff] (!%p909_p1), %v1340_v1  ;;  %241 = vst [vmem:[#allocation2 + $0x8] sm:$0xff] (!%p909_p1), %v1340_v1 }
  0x87   : > { %242 = vst [vmem:[#allocation2 + $0x10] sm:$0xff] (!%p909_p1), %v1340_v1  ;;  %243 = vst [vmem:[#allocation2 + $0x18] sm:$0xff] (!%p909_p1), %v1340_v1 }
  0x88   : > { %244 = vst [vmem:[#allocation2 + $0x20] sm:$0xff] (!%p909_p1), %v1340_v1  ;;  %245 = vst [vmem:[#allocation2 + $0x28] sm:$0xff] (!%p909_p1), %v1340_v1 }
  0x89   : > { %246 = vst [vmem:[#allocation2 + $0x30] sm:$0xff] (!%p909_p1), %v1340_v1  ;;  %247 = vst [vmem:[#allocation2 + $0x38] sm:$0xff] (!%p909_p1), %v1340_v1 }
  0x8a   : > { %248 = vst [vmem:[#allocation2 + $0x40] sm:$0xff] (!%p909_p1), %v1340_v1  ;;  %249 = vst [vmem:[#allocation2 + $0x48] sm:$0xff] (!%p909_p1), %v1340_v1 }
  0x8b   : > { %250 = vst [vmem:[#allocation2 + $0x50] sm:$0xff] (!%p909_p1), %v1340_v1  ;;  %251 = vst [vmem:[#allocation2 + $0x58] sm:$0xff] (!%p909_p1), %v1340_v1 }
  0x8c   : > { %252 = vst [vmem:[#allocation2 + $0x60] sm:$0xff] (!%p909_p1), %v1340_v1  ;;  %253 = vst [vmem:[#allocation2 + $0x68] sm:$0xff] (!%p909_p1), %v1340_v1 }
  0x8d   : > { %254 = vst [vmem:[#allocation2 + $0x70] sm:$0xff] %v1340_v1  ;;  %255 = vst [vmem:[#allocation2 + $0x78] sm:$0xff] %v1340_v1 }
  0x8e PF: > { %v272_v2 = vld [vmem:[%s1604_s12] sm:$0xff]  ;;  %v273_v3 = vld [vmem:[%s1604_s12 + $0x8] sm:$0xff]  ;;  %v282_v6 = vld [vmem:[%s1611_s4 + $0x10] sm:$0xff]  ;;  %vm320_vm1 = vcmask 523264   ;;  %s1912_s15 = sld [smem:[#allocation9_spill]] }
  0x8f   : > { %288 = vxpose.xlu0.b32.start [1/8] (short) %v272_v2, 128  ;;  %v280_v4 = vld [vmem:[%s1611_s4] sm:$0xff]  ;;  %v281_v5 = vld [vmem:[%s1611_s4 + $0x8] sm:$0xff]  ;;  %v283_v7 = vld [vmem:[%s1611_s4 + $0x18] sm:$0xff] }
  0x90   : > { %v1010_v8 = vpack.c.bf16 %v281_v5, %v280_v4  ;;  %v1014_v9 = vpack.c.bf16 %v283_v7, %v282_v6  ;;  %v284_v10 = vld [vmem:[%s1611_s4 + $0x20] sm:$0xff]  ;;  %v285_v11 = vld [vmem:[%s1611_s4 + $0x28] sm:$0xff]  ;;  %v274_v12 = vld [vmem:[%s1604_s12 + $0x10] sm:$0xff] }
  0x91   : > { %v1018_v13 = vpack.c.bf16 %v285_v11, %v284_v10  ;;  %v286_v14 = vld [vmem:[%s1611_s4 + $0x30] sm:$0xff]  ;;  %v287_v15 = vld [vmem:[%s1611_s4 + $0x38] sm:$0xff]  ;;  %v276_v18 = vld [vmem:[%s1604_s12 + $0x20] sm:$0xff] }
  0x92   : > { %1011 = vmatprep.subr.bf16.mxu0 %v1010_v8  ;;  %1026 = vmatprep.subr.bf16.mxu1 %v1010_v8  ;;  %v275_v16 = vld [vmem:[%s1604_s12 + $0x18] sm:$0xff]  ;;  %v1022_v17 = vpack.c.bf16 %v287_v15, %v286_v14  ;;  %v277_v19 = vld [vmem:[%s1604_s12 + $0x28] sm:$0xff]  ;;  %v278_v20 = vld [vmem:[%s1604_s12 + $0x30] sm:$0xff] }
  0x93   : > { %289 = vxpose.xlu0.b32.cont [2/8] (short) %v273_v3, 128  ;;  %1013 = vmatpush3.bf16.msra.mxu0 %v1010_v8  ;;  %v279_v21 = vld [vmem:[%s1604_s12 + $0x38] sm:$0xff]  ;;  %v257_v38 = vld [vmem:[#allocation2 + $0x8] sm:$0xff]  ;;  %v256_v39 = vld [vmem:[#allocation2] sm:$0xff] }
  0x94   : > { %1030 = vmatpush3.bf16.msra.mxu1 %v1010_v8  ;;  %1015 = vmatprep.subr.bf16.mxu0 %v1014_v9  ;;  %v259_v44 = vld [vmem:[#allocation2 + $0x18] sm:$0xff]  ;;  %v258_v45 = vld [vmem:[#allocation2 + $0x10] sm:$0xff]  ;;  %v261_v50 = vld [vmem:[#allocation2 + $0x28] sm:$0xff]  ;;  %p926_p3 = scmp.ne.s32.totalorder %s1912_s15, 1 }
  0x95   : > { %1027 = vmatprep.subr.bf16.mxu1 %v1014_v9  ;;  %v260_v51 = vld [vmem:[#allocation2 + $0x20] sm:$0xff]  ;;  %v263_v56 = vld [vmem:[#allocation2 + $0x38] sm:$0xff]  ;;  %v262_v57 = vld [vmem:[#allocation2 + $0x30] sm:$0xff]  ;;  %vm610_vm2 = vcmask (!%p926_p3), 0   ;;  %s1913_s27 = sld [smem:[#allocation10_spill]] (!%p926_p3) }
  0x96   : > { %v265_v62 = vld [vmem:[#allocation2 + $0x48] sm:$0xff]  ;;  %v264_v63 = vld [vmem:[#allocation2 + $0x40] sm:$0xff]  ;;  %v267_v4 = vld [vmem:[#allocation2 + $0x58] sm:$0xff] }
  0x97   : > { %290 = vxpose.xlu0.b32.cont [3/8] (short) %v274_v12, 128  ;;  %1017 = vmatpush3.bf16.msra.mxu0 %v1014_v9  ;;  %v266_v5 = vld [vmem:[#allocation2 + $0x50] sm:$0xff]  ;;  %v269_v10 = vld [vmem:[#allocation2 + $0x68] sm:$0xff]  ;;  %v268_v11 = vld [vmem:[#allocation2 + $0x60] sm:$0xff] }
  0x98   : > { %1031 = vmatpush3.bf16.msra.mxu1 %v1014_v9  ;;  %1019 = vmatprep.subr.bf16.mxu0 %v1018_v13 }
  0x99   : > { %1028 = vmatprep.subr.bf16.mxu1 %v1018_v13 }
  0x9b   : > { %291 = vxpose.xlu0.b32.cont [4/8] (short) %v275_v16, 128  ;;  %1021 = vmatpush3.bf16.msra.mxu0 %v1018_v13  ;;  %v271_v16 = vld [vmem:[#allocation2 + $0x78] sm:$0xff]  ;;  %p927_p7 = scmp.ne.s32.totalorder (!%p926_p3), %s1316_s17, %s1913_s27 }
  0x9c   : > { %1032 = vmatpush3.bf16.msra.mxu1 %v1018_v13  ;;  %1023 = vmatprep.subr.bf16.mxu0 %v1022_v17 }
  0x9d   : > { %1029 = vmatprep.subr.bf16.mxu1 %v1022_v17 }
  0x9f   : > { %292 = vxpose.xlu0.b32.cont [5/8] (short) %v276_v18, 128  ;;  %1025 = vmatpush3.bf16.msra.mxu0 %v1022_v17 }
  0xa0   : > { %1033 = vmatpush3.bf16.msra.mxu1 %v1022_v17  ;;  %v270_v17 = vld [vmem:[#allocation2 + $0x70] sm:$0xff] }
  0xa3   : > { %293 = vxpose.xlu0.b32.cont [6/8] (short) %v277_v19, 128 }
  0xa7   : > { %294 = vxpose.xlu0.b32.cont [7/8] (short) %v278_v20, 128 }
  0xab   : > { %295 = vxpose.xlu0.b32.end [8/8] (short) %v279_v21, 128 }
 0x10f   : > { %v304_v22 = vpop.trf.xlu0 }
 0x110   : > { %986 = vmatprep.mubr.msk.f32.mxu0 %vm320_vm1, %v304_v22 }
 0x113   : > { %v305_v23 = vpop.trf.xlu0 }
 0x114   : > { %987 = vmatmul.mubr.msk.f32.vlgmr.msra.gmra.mrb[0].mxu0 %vm320_vm1, %v305_v23 }
 0x117   : > { %v306_v24 = vpop.trf.xlu0 }
 0x118   : > { %989 = vmatprep.mubr.msk.f32.mxu0 %vm320_vm1, %v306_v24 }
 0x11b   : > { %v307_v25 = vpop.trf.xlu0 }
 0x11c   : > { %990 = vmatmul.mubr.msk.f32.gmra.mrb[2].mxu0 %vm320_vm1, %v307_v25 }
 0x11f   : > { %v308_v26 = vpop.trf.xlu0 }
 0x120   : > { %992 = vmatprep.mubr.msk.f32.mxu0 %vm320_vm1, %v308_v26 }
 0x123   : > { %v309_v27 = vpop.trf.xlu0 }
 0x124   : > { %993 = vmatmul.mubr.msk.f32.gmra.mrb[4].mxu0 %vm320_vm1, %v309_v27 }
 0x127   : > { %v310_v28 = vpop.trf.xlu0 }
 0x128   : > { %995 = vmatprep.mubr.msk.f32.mxu0 %vm320_vm1, %v310_v28 }
 0x12b   : > { %v311_v29 = vpop.trf.xlu0 }
 0x12c   : > { %996 = vmatmul.mubr.msk.f32.gmra.mrb[6].mxu0 %vm320_vm1, %v311_v29 }
 0x12f   : > { %v312_v30 = vpop.trf.xlu0 }
 0x130   : > { %998 = vmatprep.mubr.msk.f32.mxu1 %vm320_vm1, %v312_v30 }
 0x133   : > { %v313_v31 = vpop.trf.xlu0 }
 0x134   : > { %999 = vmatmul.mubr.msk.f32.vlgmr.msra.gmra.mrb[0].mxu1 %vm320_vm1, %v313_v31 }
 0x137   : > { %v314_v32 = vpop.trf.xlu0 }
 0x138   : > { %1001 = vmatprep.mubr.msk.f32.mxu1 %vm320_vm1, %v314_v32 }
 0x13b   : > { %v315_v33 = vpop.trf.xlu0 }
 0x13c   : > { %1002 = vmatmul.mubr.msk.f32.gmra.mrb[2].mxu1 %vm320_vm1, %v315_v33 }
 0x13f   : > { %v316_v34 = vpop.trf.xlu0 }
 0x140   : > { %1004 = vmatprep.mubr.msk.f32.mxu1 %vm320_vm1, %v316_v34 }
 0x143   : > { %v317_v35 = vpop.trf.xlu0 }
 0x144   : > { %1005 = vmatmul.mubr.msk.f32.gmra.mrb[4].mxu1 %vm320_vm1, %v317_v35 }
 0x147   : > { %v318_v36 = vpop.trf.xlu0 }
 0x148   : > { %1007 = vmatprep.mubr.msk.f32.mxu1 %vm320_vm1, %v318_v36 }
 0x14b   : > { %v319_v37 = vpop.trf.xlu0 }
 0x14c   : > { %1008 = vmatmul.mubr.msk.f32.gmra.mrb[6].mxu1 %vm320_vm1, %v319_v37 }
 0x1e7   : > { %v988_v40 = vpop.f32.mrb[0].mxu0 }
 0x1e8   : > { %v515_v41 = vadd.f32 %v988_v40, %v257_v38  ;;  %v435_v42 = vpop.f32.mrb[1].mxu0 }
 0x1e9   : > { %v514_v43 = vadd.f32 %v435_v42, %v256_v39 }
 0x1ea   : > { %531 = vst [vmem:[#allocation2 + $0x8] sm:$0xff] %v515_v41 }
 0x1eb   : > { %530 = vst [vmem:[#allocation2] sm:$0xff] %v514_v43 }
 0x1ef   : > { %v991_v46 = vpop.f32.mrb[2].mxu0 }
 0x1f0   : > { %v517_v47 = vadd.f32 %v991_v46, %v259_v44  ;;  %v445_v48 = vpop.f32.mrb[3].mxu0 }
 0x1f1   : > { %v516_v49 = vadd.f32 %v445_v48, %v258_v45  ;;  %v1663_v23 = vld [vmem:[#allocation2 + $0x8] sm:$0xff] (!%p926_p3) }
 0x1f2   : > { %533 = vst [vmem:[#allocation2 + $0x18] sm:$0xff] %v517_v47  ;;  %v1661_v22 = vld [vmem:[#allocation2] sm:$0xff] (!%p926_p3)  ;;  %v568_v27 = vmul.f32 (!%p926_p3), %v1663_v23, %v1663_v23 }
 0x1f3   : > { %532 = vst [vmem:[#allocation2 + $0x10] sm:$0xff] %v516_v49  ;;  %v567_v26 = vmul.f32 (!%p926_p3), %v1661_v22, %v1661_v22 }
 0x1f5   : > { %v583_v31 = vadd.f32 (!%p926_p3), %v568_v27, %v567_v26 }
 0x1f7   : > { %v994_v52 = vpop.f32.mrb[4].mxu0 }
 0x1f8   : > { %v519_v53 = vadd.f32 %v994_v52, %v261_v50  ;;  %v455_v54 = vpop.f32.mrb[5].mxu0 }
 0x1f9   : > { %v518_v55 = vadd.f32 %v455_v54, %v260_v51  ;;  %v1667_v25 = vld [vmem:[#allocation2 + $0x18] sm:$0xff] (!%p926_p3) }
 0x1fa   : > { %535 = vst [vmem:[#allocation2 + $0x28] sm:$0xff] %v519_v53  ;;  %v1665_v24 = vld [vmem:[#allocation2 + $0x10] sm:$0xff] (!%p926_p3)  ;;  %v570_v30 = vmul.f32 (!%p926_p3), %v1667_v25, %v1667_v25 }
 0x1fb   : > { %534 = vst [vmem:[#allocation2 + $0x20] sm:$0xff] %v518_v55  ;;  %v569_v28 = vmul.f32 (!%p926_p3), %v1665_v24, %v1665_v24 }
 0x1fd   : > { %v584_v34 = vadd.f32 (!%p926_p3), %v583_v31, %v569_v28 }
 0x1ff   : > { %v997_v58 = vpop.f32.mrb[6].mxu0  ;;  %v585_v37 = vadd.f32 (!%p926_p3), %v584_v34, %v570_v30 }
 0x200   : > { %v521_v59 = vadd.f32 %v997_v58, %v263_v56  ;;  %v465_v60 = vpop.f32.mrb[7].mxu0 }
 0x201   : > { %v520_v61 = vadd.f32 %v465_v60, %v262_v57  ;;  %v555_v32 = vld [vmem:[#allocation2 + $0x28] sm:$0xff] (!%p926_p3) }
 0x202   : > { %537 = vst [vmem:[#allocation2 + $0x38] sm:$0xff] %v521_v59  ;;  %v1675_v29 = vld [vmem:[#allocation2 + $0x20] sm:$0xff] (!%p926_p3)  ;;  %v572_v36 = vmul.f32 (!%p926_p3), %v555_v32, %v555_v32 }
 0x203   : > { %536 = vst [vmem:[#allocation2 + $0x30] sm:$0xff] %v520_v61  ;;  %v571_v33 = vmul.f32 (!%p926_p3), %v1675_v29, %v1675_v29 }
 0x205   : > { %v586_v40 = vadd.f32 (!%p926_p3), %v585_v37, %v571_v33 }
 0x207   : > { %v1000_v0 = vpop.f32.mrb[0].mxu1  ;;  %v587_v43 = vadd.f32 (!%p926_p3), %v586_v40, %v572_v36 }
 0x208   : > { %v523_v1 = vadd.f32 %v1000_v0, %v265_v62  ;;  %v475_v2 = vpop.f32.mrb[1].mxu1 }
 0x209   : > { %v522_v3 = vadd.f32 %v475_v2, %v264_v63  ;;  %v557_v38 = vld [vmem:[#allocation2 + $0x38] sm:$0xff] (!%p926_p3) }
 0x20a   : > { %539 = vst [vmem:[#allocation2 + $0x48] sm:$0xff] %v523_v1  ;;  %v556_v35 = vld [vmem:[#allocation2 + $0x30] sm:$0xff] (!%p926_p3)  ;;  %v574_v42 = vmul.f32 (!%p926_p3), %v557_v38, %v557_v38 }
 0x20b   : > { %538 = vst [vmem:[#allocation2 + $0x40] sm:$0xff] %v522_v3  ;;  %v573_v39 = vmul.f32 (!%p926_p3), %v556_v35, %v556_v35 }
 0x20d   : > { %v588_v46 = vadd.f32 (!%p926_p3), %v587_v43, %v573_v39 }
 0x20f   : > { %v1003_v6 = vpop.f32.mrb[2].mxu1  ;;  %v589_v49 = vadd.f32 (!%p926_p3), %v588_v46, %v574_v42 }
 0x210   : > { %v525_v7 = vadd.f32 %v1003_v6, %v267_v4  ;;  %v485_v8 = vpop.f32.mrb[3].mxu1 }
 0x211   : > { %v524_v9 = vadd.f32 %v485_v8, %v266_v5  ;;  %v559_v44 = vld [vmem:[#allocation2 + $0x48] sm:$0xff] (!%p926_p3) }
 0x212   : > { %541 = vst [vmem:[#allocation2 + $0x58] sm:$0xff] %v525_v7  ;;  %v558_v41 = vld [vmem:[#allocation2 + $0x40] sm:$0xff] (!%p926_p3)  ;;  %v576_v48 = vmul.f32 (!%p926_p3), %v559_v44, %v559_v44 }
 0x213   : > { %540 = vst [vmem:[#allocation2 + $0x50] sm:$0xff] %v524_v9  ;;  %v575_v45 = vmul.f32 (!%p926_p3), %v558_v41, %v558_v41 }
 0x215   : > { %v590_v52 = vadd.f32 (!%p926_p3), %v589_v49, %v575_v45 }
 0x217   : > { %v1006_v12 = vpop.f32.mrb[4].mxu1  ;;  %v591_v55 = vadd.f32 (!%p926_p3), %v590_v52, %v576_v48 }
 0x218   : > { %v527_v13 = vadd.f32 %v1006_v12, %v269_v10  ;;  %v495_v14 = vpop.f32.mrb[5].mxu1  ;;  %v566_v12 = vld [vmem:[%s1624_s9] sm:$0x1] (!%p926_p3) }
 0x219   : > { %v526_v15 = vadd.f32 %v495_v14, %v268_v11  ;;  %v561_v50 = vld [vmem:[#allocation2 + $0x58] sm:$0xff] (!%p926_p3) }
 0x21a   : > { %543 = vst [vmem:[#allocation2 + $0x68] sm:$0xff] %v527_v13  ;;  %v560_v47 = vld [vmem:[#allocation2 + $0x50] sm:$0xff] (!%p926_p3)  ;;  %v578_v54 = vmul.f32 (!%p926_p3), %v561_v50, %v561_v50 }
 0x21b   : > { %542 = vst [vmem:[#allocation2 + $0x60] sm:$0xff] %v526_v15  ;;  %v577_v51 = vmul.f32 (!%p926_p3), %v560_v47, %v560_v47 }
 0x21d   : > { %549 = sbr.rel (%p926_p3) target bundleno = 1009 (0x3f1), region = 48  ;;  %v592_v58 = vadd.f32 (!%p926_p3), %v591_v55, %v577_v51 }
 0x21f   : > { %v1009_v18 = vpop.f32.mrb[6].mxu1  ;;  %v593_v61 = vadd.f32 (!%p926_p3), %v592_v58, %v578_v54 }
 0x220   : > { %v529_v19 = vadd.f32 %v1009_v18, %v271_v16  ;;  %v505_v20 = vpop.f32.mrb[7].mxu1 }
 0x221   : > { %v528_v21 = vadd.f32 %v505_v20, %v270_v17  ;;  %v1681_v56 = vld [vmem:[#allocation2 + $0x68] sm:$0xff] (!%p926_p3) }
 0x222   : > { %545 = vst [vmem:[#allocation2 + $0x78] sm:$0xff] %v529_v19  ;;  %v562_v53 = vld [vmem:[#allocation2 + $0x60] sm:$0xff] (!%p926_p3)  ;;  %v580_v60 = vmul.f32 (!%p926_p3), %v1681_v56, %v1681_v56 }
 0x223   : > { %544 = vst [vmem:[#allocation2 + $0x70] sm:$0xff] %v528_v21  ;;  %v579_v57 = vmul.f32 (!%p926_p3), %v562_v53, %v562_v53 }
 0x224   : > { %v616_v15 = vlaneseq (!%p927_p7)  ;;  %v635_v16 = vmul.f32 (!%p927_p7), 0.0078125, %v1661_v22  ;;  %v636_v17 = vmul.f32 (!%p927_p7), 0.0078125, %v1663_v23  ;;  %v637_v19 = vmul.f32 (!%p927_p7), 0.0078125, %v1665_v24 }
 0x225   : > { %v594_v0 = vadd.f32 %v593_v61, %v579_v57  ;;  %v638_v20 = vmul.f32 (!%p927_p7), 0.0078125, %v1667_v25  ;;  %v639_v21 = vmul.f32 (!%p927_p7), 0.0078125, %v1675_v29  ;;  %v640_v27 = vmul.f32 (!%p927_p7), 0.0078125, %v555_v32 }
 0x226   : > { %v1700_v18 = vshrl.u32 (!%p927_p7), %v616_v15, 7  ;;  %v1705_v26 = vand.u32 (!%p927_p7), 127, %v616_v15  ;;  %v1707_v28 = vmul.f32 (!%p927_p7), 0.0078125, %v556_v35  ;;  %v1709_v30 = vmul.f32 (!%p927_p7), 0.0078125, %v557_v38 }
 0x227   : > { %v595_v2 = vadd.f32 %v594_v0, %v580_v60  ;;  %v1711_v31 = vmul.f32 (!%p927_p7), 0.0078125, %v558_v41  ;;  %v1713_v22 = vmul.f32 (!%p927_p7), 0.0078125, %v559_v44  ;;  %v1715_v23 = vmul.f32 (!%p927_p7), 0.0078125, %v560_v47 }
 0x228   : > { %v928_v33 = vadd.f32 (!%p927_p7), -1.0, %v635_v16  ;;  %v1717_v34 = vmul.f32 (!%p927_p7), 0.0078125, %v561_v50  ;;  %v929_v24 = vadd.f32 (!%p927_p7), -1.0, %v636_v17  ;;  %v699_v25 = vmul.f32 (!%p927_p7), 0.005, %v635_v16 }
 0x229   : > { %v1687_v62 = vld [vmem:[#allocation2 + $0x78] sm:$0xff]  ;;  %v700_v36 = vmul.f32 (!%p927_p7), 0.005, %v636_v17  ;;  %v618_v29 = vadd.s32 (!%p927_p7), 8, %v1700_v18  ;;  %v619_v32 = vadd.s32 (!%p927_p7), 16, %v1700_v18  ;;  %v620_v35 = vadd.s32 (!%p927_p7), 24, %v1700_v18 }
 0x22a   : > { %v1683_v59 = vld [vmem:[#allocation2 + $0x70] sm:$0xff]  ;;  %v582_v1 = vmul.f32 %v1687_v62, %v1687_v62  ;;  %v1722_v37 = vmul.f32 (!%p927_p7), 0.0078125, %v562_v53  ;;  %v1725_v38 = vadd.s32 (!%p927_p7), 32, %v1700_v18  ;;  %v1728_v39 = vadd.s32 (!%p927_p7), 40, %v1700_v18 }
 0x22b   : > { %v581_v63 = vmul.f32 %v1683_v59, %v1683_v59  ;;  %v930_v40 = vadd.f32 (!%p927_p7), -1.0, %v637_v19  ;;  %v701_v41 = vmul.f32 (!%p927_p7), 0.005, %v637_v19  ;;  %v1731_v42 = vadd.s32 (!%p927_p7), 48, %v1700_v18 }
 0x22c   : > { %v1734_v43 = vadd.s32 (!%p927_p7), 56, %v1700_v18  ;;  %v931_v44 = vadd.f32 (!%p927_p7), -1.0, %v638_v20  ;;  %v683_v45 = vmul.f32 (!%p927_p7), %v928_v33, %v928_v33  ;;  %v684_v46 = vmul.f32 (!%p927_p7), %v929_v24, %v929_v24 }
 0x22d   : > { %v596_v3 = vadd.f32 %v595_v2, %v581_v63  ;;  %v702_v47 = vmul.f32 (!%p927_p7), 0.005, %v638_v20  ;;  %v715_v48 = vmul.f32 (!%p927_p7), %v699_v25, %v635_v16  ;;  %v716_v49 = vmul.f32 (!%p927_p7), %v700_v36, %v636_v17 }
 0x22e   : > { %v1737_v50 = vadd.s32 (!%p927_p7), 64, %v1700_v18  ;;  %v1740_v51 = vadd.s32 (!%p927_p7), 72, %v1700_v18  ;;  %v1743_v52 = vadd.s32 (!%p927_p7), 80, %v1700_v18  ;;  %v1746_v53 = vadd.s32 (!%p927_p7), 88, %v1700_v18 }
 0x22f   : > { %v597_v4 = vadd.f32 %v596_v3, %v582_v1  ;;  %v932_v54 = vadd.f32 (!%p927_p7), -1.0, %v639_v21  ;;  %v685_v55 = vmul.f32 (!%p927_p7), %v930_v40, %v930_v40  ;;  %v703_v57 = vmul.f32 (!%p927_p7), 0.005, %v639_v21 }
 0x230   : > { %v717_v58 = vmul.f32 (!%p927_p7), %v701_v41, %v637_v19  ;;  %v1749_v60 = vadd.s32 (!%p927_p7), 96, %v1700_v18  ;;  %v1752_v61 = vmul.f32 (!%p927_p7), 0.0078125, %v1681_v56  ;;  %v933_v63 = vadd.f32 (!%p927_p7), -1.0, %v640_v27 }
 0x231   : > { %598 = vadd.xlane.f32.xlu0 %v597_v4  ;;  %v686_v0 = vmul.f32 (!%p927_p7), %v931_v44, %v931_v44  ;;  %v704_v1 = vmul.f32 (!%p927_p7), 0.005, %v640_v27  ;;  %v718_v2 = vmul.f32 (!%p927_p7), %v702_v47, %v638_v20  ;;  %v731_v3 = vsub.f32 (!%p927_p7), %v683_v45, %v715_v48 }
 0x232   : > { %v732_v4 = vsub.f32 (!%p927_p7), %v684_v46, %v716_v49  ;;  %vm651_vm3 = vcmp.eq.s32.totalorder (!%p927_p7), %v1700_v18, %v1705_v26  ;;  %vm652_vm4 = vcmp.eq.s32.totalorder (!%p927_p7), %v618_v29, %v1705_v26  ;;  %v705_v56 = vmul.f32 (!%p927_p7), 0.005, %v1707_v28 }
 0x233   : > { %vm653_vm5 = vcmp.eq.s32.totalorder (!%p927_p7), %v619_v32, %v1705_v26  ;;  %v1766_v16 = vmul.f32 (!%p927_p7), 0.0078125, %v1687_v62  ;;  %vm654_vm6 = vcmp.eq.s32.totalorder (!%p927_p7), %v620_v35, %v1705_v26  ;;  %v936_v17 = vadd.f32 (!%p927_p7), -1.0, %v1711_v31 }
 0x234   : > { %v748_v15 = vsel (!%p927_p7), %vm652_vm4, %v732_v4, 0.0  ;;  %v707_v20 = vmul.f32 (!%p927_p7), 0.005, %v1711_v31  ;;  %vm655_vm7 = vcmp.eq.s32.totalorder (!%p927_p7), %v1725_v38, %v1705_v26  ;;  %v708_v62 = vmul.f32 (!%p927_p7), 0.005, %v1713_v22 }
 0x235   : > { %vm656_vm8 = vcmp.eq.s32.totalorder (!%p927_p7), %v1728_v39, %v1705_v26  ;;  %v691_v40 = vmul.f32 (!%p927_p7), %v936_v17, %v936_v17  ;;  %v709_v44 = vmul.f32 (!%p927_p7), 0.005, %v1715_v23  ;;  %vm657_vm9 = vcmp.eq.s32.totalorder (!%p927_p7), %v1731_v42, %v1705_v26 }
 0x236   : > { %v723_v38 = vmul.f32 (!%p927_p7), %v707_v20, %v1711_v31  ;;  %v710_v49 = vmul.f32 (!%p927_p7), 0.005, %v1717_v34  ;;  %v724_v39 = vmul.f32 (!%p927_p7), %v708_v62, %v1713_v22  ;;  %vm658_vm10 = vcmp.eq.s32.totalorder (!%p927_p7), %v1734_v43, %v1705_v26 }
 0x237   : > { %v940_v31 = vadd.f32 (!%p927_p7), -1.0, %v1722_v37  ;;  %v725_v42 = vmul.f32 (!%p927_p7), %v709_v44, %v1715_v23  ;;  %vm659_vm11 = vcmp.eq.s32.totalorder (!%p927_p7), %v1737_v50, %v1705_v26  ;;  %v712_v4 = vmul.f32 (!%p927_p7), 0.005, %v1752_v61 }
 0x238   : > { %v726_v43 = vmul.f32 (!%p927_p7), %v710_v49, %v1717_v34  ;;  %vm660_vm12 = vcmp.eq.s32.totalorder (!%p927_p7), %v1740_v51, %v1705_v26  ;;  %vm661_vm13 = vcmp.eq.s32.totalorder (!%p927_p7), %v1743_v52, %v1705_v26  ;;  %v630_v17 = vadd.s32 (!%p927_p7), 104, %v1700_v18 }
 0x239   : > { %v728_v51 = vmul.f32 (!%p927_p7), %v712_v4, %v1752_v61  ;;  %vm662_vm14 = vcmp.eq.s32.totalorder (!%p927_p7), %v1746_v53, %v1705_v26  ;;  %vm663_vm15 = vcmp.eq.s32.totalorder (!%p927_p7), %v1749_v60, %v1705_v26  ;;  %v632_v62 = vadd.s32 (!%p927_p7), 120, %v1700_v18 }
 0x23a   : > { %vm664_vm0 = vcmp.eq.s32.totalorder (!%p927_p7), %v630_v17, %v1705_v26 }
 0x2be   : > { %v599_v5 = vpop.xlane.xlu0 %598 }
 0x2bf   : > { %v600_v6 = vrot.slane %v599_v5, 4 }
 0x2c1   : > { %v601_v7 = vadd.f32 %v600_v6, %v599_v5  ;;  %v1755_v5 = vmul.f32 (!%p927_p7), 0.0078125, %v1683_v59  ;;  %v934_v6 = vadd.f32 (!%p927_p7), -1.0, %v1707_v28  ;;  %v706_v59 = vmul.f32 (!%p927_p7), 0.005, %v1709_v30 }
 0x2c3   : > { %v602_v8 = vrot.slane %v601_v7, 2  ;;  %v689_v19 = vmul.f32 (!%p927_p7), %v934_v6, %v934_v6  ;;  %v722_v29 = vmul.f32 (!%p927_p7), %v706_v59, %v1709_v30 }
 0x2c5   : > { %v603_v9 = vadd.f32 %v602_v8, %v601_v7  ;;  %v687_v7 = vmul.f32 (!%p927_p7), %v932_v54, %v932_v54  ;;  %v719_v8 = vmul.f32 (!%p927_p7), %v703_v57, %v639_v21  ;;  %v721_v21 = vmul.f32 (!%p927_p7), %v705_v56, %v1707_v28 }
 0x2c6   : > { %v938_v28 = vadd.f32 (!%p927_p7), -1.0, %v1715_v23  ;;  %v942_v23 = vadd.f32 (!%p927_p7), -1.0, %v1755_v5  ;;  %v695_v56 = vmul.f32 (!%p927_p7), %v940_v31, %v940_v31 }
 0x2c7   : > { %v604_v10 = vrot.slane %v603_v9, 1  ;;  %v735_v33 = vsub.f32 (!%p927_p7), %v687_v7, %v719_v8  ;;  %v737_v45 = vsub.f32 (!%p927_p7), %v689_v19, %v721_v21 }
 0x2c8   : > { %v693_v57 = vmul.f32 (!%p927_p7), %v938_v28, %v938_v28  ;;  %v697_v19 = vmul.f32 (!%p927_p7), %v942_v23, %v942_v23 }
 0x2c9   : > { %v605_v11 = vadd.f32 %v604_v10, %v603_v9  ;;  %v733_v9 = vsub.f32 (!%p927_p7), %v685_v55, %v717_v58  ;;  %v935_v10 = vadd.f32 (!%p927_p7), -1.0, %v1709_v30  ;;  %v751_v46 = vsel (!%p927_p7), %vm655_vm7, %v735_v33, 0.0 }
 0x2ca   : > { %v939_v30 = vadd.f32 (!%p927_p7), -1.0, %v1717_v34  ;;  %v943_v34 = vadd.f32 (!%p927_p7), -1.0, %v1766_v16  ;;  %v631_v33 = vadd.s32 (!%p927_p7), 112, %v1700_v18 }
 0x2cb   : > { %1036 = vpush %v605_v11  ;;  %v688_v11 = vmul.f32 (!%p927_p7), %v933_v63, %v933_v63  ;;  %v749_v24 = vsel (!%p927_p7), %vm653_vm5, %v733_v9, 0.0  ;;  %v690_v25 = vmul.f32 (!%p927_p7), %v935_v10, %v935_v10  ;;  %v711_v63 = vmul.f32 (!%p927_p7), 0.005, %v1722_v37 }
 0x2cc   : > { %v713_v9 = vmul.f32 (!%p927_p7), 0.005, %v1755_v5  ;;  %v741_v10 = vsub.f32 (!%p927_p7), %v693_v57, %v725_v42  ;;  %vm665_vm1 = vcmp.eq.s32.totalorder (!%p927_p7), %v631_v33, %v1705_v26 }
 0x2cd   : > { %v738_v54 = vsub.f32 (!%p927_p7), %v690_v25, %v722_v29  ;;  %v727_v50 = vmul.f32 (!%p927_p7), %v711_v63, %v1722_v37 }
 0x2ce   : > { %v729_v20 = vmul.f32 (!%p927_p7), %v713_v9, %v1755_v5  ;;  %v757_v21 = vsel (!%p927_p7), %vm661_vm13, %v741_v10, 0.0 }
 0x2cf   : > { %v754_v7 = vsel (!%p927_p7), %vm658_vm10, %v738_v54, 0.0  ;;  %v743_v52 = vsub.f32 (!%p927_p7), %v695_v56, %v727_v50 }
 0x2d0   : > { %v745_v29 = vsub.f32 (!%p927_p7), %v697_v19, %v729_v20 }
 0x2d1   : > { %v759_v5 = vsel (!%p927_p7), %vm663_vm15, %v743_v52, 0.0 }
 0x2fc   : > { %s1037_s16 = spop %1036  ;;  %615 = sbr.rel (%p927_p7) target bundleno = 1009 (0x3f1), region = 52 }
 0x2fd   : > { %s607_s23 = smul.f32 3.0517577e-07, %s1037_s16 }
 0x2ff   : > { %v608_v13 = vstv %s607_s23 }
 0x300   : > { %v609_v14 = vadd.f32 %v608_v13, %v566_v12  ;;  %v720_v12 = vmul.f32 (!%p927_p7), %v704_v1, %v640_v27  ;;  %v734_v13 = vsub.f32 (!%p927_p7), %v686_v0, %v718_v2  ;;  %v937_v27 = vadd.f32 (!%p927_p7), -1.0, %v1713_v22 }
 0x301   : > { %v739_v0 = vsub.f32 (!%p927_p7), %v691_v40, %v723_v38  ;;  %v753_v1 = vsel (!%p927_p7), %vm657_vm9, %v737_v45, 0.0  ;;  %v941_v22 = vadd.f32 (!%p927_p7), -1.0, %v1752_v61  ;;  %v694_v2 = vmul.f32 (!%p927_p7), %v939_v30, %v939_v30 }
 0x302   : > { %611 = vst.msk [vmem:[%s1624_s9] sm:$0x1] %vm610_vm2, %v609_v14  ;;  %v747_v14 = vsel (!%p927_p7), %vm651_vm3, %v731_v3, 0.0  ;;  %v736_v32 = vsub.f32 (!%p927_p7), %v688_v11, %v720_v12  ;;  %v750_v35 = vsel (!%p927_p7), %vm654_vm6, %v734_v13, 0.0  ;;  %v692_v47 = vmul.f32 (!%p927_p7), %v937_v27, %v937_v27 }
 0x303   : > { %v763_v36 = vadd.f32 %v748_v15, %v747_v14  ;;  %v755_v11 = vsel %vm659_vm11, %v739_v0, 0.0  ;;  %v696_v59 = vmul.f32 %v941_v22, %v941_v22  ;;  %v714_v13 = vmul.f32 0.005, %v1766_v16 }
 0x304   : > { %v752_v55 = vsel %vm656_vm8, %v736_v32, 0.0  ;;  %v740_v6 = vsub.f32 %v692_v47, %v724_v39  ;;  %v742_v14 = vsub.f32 %v694_v2, %v726_v43  ;;  %v698_v61 = vmul.f32 %v943_v34, %v943_v34 }
 0x305   : > { %v764_v41 = vadd.f32 %v763_v36, %v749_v24  ;;  %v730_v27 = vmul.f32 %v714_v13, %v1766_v16  ;;  %v744_v25 = vsub.f32 %v696_v59, %v728_v51  ;;  %vm666_vm3 = vcmp.eq.s32.totalorder %v632_v62, %v1705_v26 }
 0x306   : > { %v756_v15 = vsel %vm660_vm12, %v740_v6, 0.0  ;;  %v758_v36 = vsel %vm662_vm14, %v742_v14, 0.0  ;;  %v761_v40 = vsel %vm665_vm1, %v745_v29, 0.0 }
 0x307   : > { %v765_v48 = vadd.f32 %v764_v41, %v750_v35  ;;  %v746_v35 = vsub.f32 %v698_v61, %v730_v27  ;;  %v760_v28 = vsel %vm664_vm0, %v744_v25, 0.0 }
 0x309   : > { %v766_v58 = vadd.f32 %v765_v48, %v751_v46  ;;  %v762_v41 = vsel %vm666_vm3, %v746_v35, 0.0  ;;  %v787_v39 = vld [vmem:[%s1624_s9] sm:$0x1] }
 0x30b   : > { %v767_v3 = vadd.f32 %v766_v58, %v752_v55 }
 0x30d   : > { %v768_v8 = vadd.f32 %v767_v3, %v753_v1 }
 0x30f   : > { %v769_v12 = vadd.f32 %v768_v8, %v754_v7 }
 0x311   : > { %v770_v37 = vadd.f32 %v769_v12, %v755_v11 }
 0x313   : > { %v771_v24 = vadd.f32 %v770_v37, %v756_v15 }
 0x315   : > { %v772_v53 = vadd.f32 %v771_v24, %v757_v21 }
 0x317   : > { %v773_v32 = vadd.f32 %v772_v53, %v758_v36 }
 0x319   : > { %v774_v60 = vadd.f32 %v773_v32, %v759_v5 }
 0x31b   : > { %v775_v16 = vadd.f32 %v774_v60, %v760_v28 }
 0x31d   : > { %v776_v44 = vadd.f32 %v775_v16, %v761_v40 }
 0x31f   : > { %v777_v18 = vadd.f32 %v776_v44, %v762_v41 }
 0x321   : > { %778 = vadd.xlane.f32.xlu0 %v777_v18 }
 0x3ae   : > { %v779_v38 = vpop.xlane.xlu0 %778 }
 0x3af   : > { %v780_v45 = vrot.slane %v779_v38, 4 }
 0x3b1   : > { %v781_v46 = vadd.f32 %v780_v45, %v779_v38 }
 0x3b3   : > { %v782_v30 = vrot.slane %v781_v46, 2 }
 0x3b5   : > { %v783_v47 = vadd.f32 %v782_v30, %v781_v46 }
 0x3b7   : > { %v784_v48 = vrot.slane %v783_v47, 1 }
 0x3b9   : > { %v785_v49 = vadd.f32 %v784_v48, %v783_v47 }
 0x3bb   : > { %1038 = vpush %v785_v49 }
 0x3ec   : > { %s1039_s17 = spop %1038 }
 0x3ed   : > { %v788_v26 = vstv %s1039_s17 }
 0x3ee   : > { %v789_v54 = vadd.f32 %v788_v26, %v787_v39 }
 0x3f0   : > { %790 = vst.msk [vmem:[%s1624_s9] sm:$0x1] %vm610_vm2, %v789_v54 }
 0x3f1 PF: > { %s18_s21 = sadd.s32 1, %s1332_s21   ;;  %s1915_s0 = sld [smem:[#allocation11_spill]] }
 0x3f2   : > { %p1823_p4 = scmp.ge.s32.totalorder %s18_s21, 20   ;;  %s1916_s22 = sld [smem:[#allocation12_spill]] }
 0x3f3   : > { %s1917_s9 = smov %s1288_s10  ;;  %s1918_s10 = smov %s1292_s11 }
 0x3f4   : > { %s1919_s11 = smov %s1542_s28  ;;  %s1920_s12 = smov %s1300_s13 }
 0x3f5   : > { %s1921_s13 = smov %s1304_s14  ;;  %s1922_s14 = smov %s1558_s7 }
 0x3f6   : > { %s1923_s15 = smov %s1320_s18  ;;  %s1924_s16 = smov %s1324_s19 }
 0x3f7   : > { %s1925_s17 = smov %s1328_s20  ;;  %s1926_s18 = smov %s1915_s0 }
 0x3f8   : > { %s1927_s19 = smov %s1916_s22  ;;  %s1928_s20 = smov %s1938_s24 }
 0x3f9   :  { %17 = sbr.rel (!%p1823_p4) target bundleno = 13 (0xd), region = 97 }
 0x400   :  { %808 = vsyncpa [#allocation4], 1 }
 0x401   :  { %810 = vsyncpa [#allocation4 + $0x1], 1 }
 0x402   :  { %811 = vsyncpa [#allocation6], 1 }
 0x403   :  { %813 = vsyncpa [#allocation6 + $0x1], 1 }

</bundles_post_ra>
